<compile_context>
chip_gen: v6e
topology: v6e:2x2x1
jax: 0.10.0
libtpu: 0.0.40
codegen_flags: <defaults>
</compile_context>

<pallas_src>
import jax
import jax.numpy as jnp
from jax.experimental import pallas as pl
from jax.experimental.pallas import tpu as pltpu

LANE = 128        # TPU lane width (hidden-dim padding target)
SUBLANE = 8       # f32 sublane count (batch tile multiple)
MAX_TILE_B = 2048 # max batch rows per grid step


def _round_up(x, m):
    return (x + m - 1) // m * m


def _actor_kernel(x_ref, w1_ref, b1_ref, w2_ref, b2_ref, w3_ref, b3_ref, o_ref):
    # bf16 inputs to the MXU, f32 accumulation; elementwise math in f32.
    x = x_ref[...].astype(jnp.bfloat16)
    h1 = jnp.dot(x, w1_ref[...], preferred_element_type=jnp.float32) + b1_ref[...]
    h1 = jnp.maximum(h1, 0.0)
    h2 = jnp.dot(h1.astype(jnp.bfloat16), w2_ref[...],
                 preferred_element_type=jnp.float32) + b2_ref[...]
    h2 = jnp.maximum(h2, 0.0)
    h3 = jnp.dot(h2.astype(jnp.bfloat16), w3_ref[...],
                 preferred_element_type=jnp.float32) + b3_ref[...]
    # Only the real A action columns are stored (no padded output lanes).
    o_ref[...] = jnp.tanh(h3).astype(o_ref.dtype)


def prepare_actor_params(params):
    """One-time pad + bf16 cast into the kernel's canonical layout.

    Hidden dims are zero-padded to 128 lanes (mathematically exact); the
    output (action) dim of w3/b3 is left unpadded so the kernel writes only
    the real columns.  Weights -> bf16 (MXU inputs), biases stay f32.
    """
    w1, b1 = params["w1"], params["b1"]
    w2, b2 = params["w2"], params["b2"]
    w3, b3 = params["w3"], params["b3"]
    S, H1 = w1.shape
    H2 = w2.shape[1]
    A = w3.shape[1]
    H1p = _round_up(H1, LANE)
    H2p = _round_up(H2, LANE)
    return {
        "w1": jnp.pad(w1, ((0, 0), (0, H1p - H1))).astype(jnp.bfloat16),
        "b1": jnp.pad(b1, ((0, 0), (0, H1p - H1))),                      # f32
        "w2": jnp.pad(w2, ((0, H1p - H1), (0, H2p - H2))).astype(jnp.bfloat16),
        "b2": jnp.pad(b2, ((0, 0), (0, H2p - H2))),                      # f32
        "w3": jnp.pad(w3, ((0, H2p - H2), (0, 0))).astype(jnp.bfloat16),  # out dim unpadded
        "b3": b3,                                                        # f32 (1, A)
        "dims": (S, H1, H2, A),
    }


def actor_forward(state, prepped):
    """state: [B, state_size] f32.  prepped: output of prepare_actor_params."""
    w1p, b1p = prepped["w1"], prepped["b1"]
    w2p, b2p = prepped["w2"], prepped["b2"]
    w3p, b3p = prepped["w3"], prepped["b3"]
    S, H1, H2, A = prepped["dims"]

    B = state.shape[0]

    # Batch tile: multiple of 8 sublanes, capped at MAX_TILE_B; aim for >= 2
    # grid steps so v7x's two TensorCores both get work (no-op on v5e/v6e).
    tile_b = min(MAX_TILE_B, _round_up(max((B + 1) // 2, 1), SUBLANE))
    B_pad = _round_up(B, tile_b)
    x = state if B_pad == B else jnp.pad(state, ((0, B_pad - B), (0, 0)))
    grid = (B_pad // tile_b,)

    # Cost estimate from true (unpadded) dims.
    flops = 2 * B * (S * H1 + H1 * H2 + H2 * A)
    bytes_accessed = (state.size * 4 + B * A * 4
                      + (w1p.size + w2p.size + w3p.size) * 2
                      + (b1p.size + b2p.size + b3p.size) * 4)

    const = lambda shp: pl.BlockSpec(shp, lambda i: (0, 0))  # grid-invariant operands

    out = pl.pallas_call(
        _actor_kernel,
        out_shape=jax.ShapeDtypeStruct((B_pad, A), jnp.float32),
        grid=grid,
        in_specs=[
            pl.BlockSpec((tile_b, S), lambda i: (i, 0)),   # state tile (pipelined)
            const(w1p.shape), const(b1p.shape),
            const(w2p.shape), const(b2p.shape),
            const(w3p.shape), const(b3p.shape),
        ],
        out_specs=pl.BlockSpec((tile_b, A), lambda i: (i, 0)),
        compiler_params=pltpu.CompilerParams(
            dimension_semantics=("parallel",)),
        cost_estimate=pl.CostEstimate(
            flops=flops,
            transcendentals=B * A,
            bytes_accessed=bytes_accessed),
    )(x, w1p, b1p, w2p, b2p, w3p, b3p)

    # Strip batch padding only (no column padding to strip anymore).
    return out[:B]


def init_actor_params(key, state_size, action_size, hidden1=64, hidden2=64):
    """Deterministic init mimicking PyTorch nn.Linear default:
    U(-1/sqrt(fan_in), 1/sqrt(fan_in)) for both weight and bias."""
    def linear(k, fan_in, fan_out):
        kw, kb = jax.random.split(k)
        bound = 1.0 / jnp.sqrt(float(fan_in))
        w = jax.random.uniform(kw, (fan_in, fan_out), jnp.float32, -bound, bound)
        b = jax.random.uniform(kb, (1, fan_out), jnp.float32, -bound, bound)
        return w, b

    k1, k2, k3 = jax.random.split(key, 3)
    w1, b1 = linear(k1, state_size, hidden1)
    w2, b2 = linear(k2, hidden1, hidden2)
    w3, b3 = linear(k3, hidden2, action_size)
    return {"w1": w1, "b1": b1, "w2": w2, "b2": b2, "w3": w3, "b3": b3}


def _reference_forward(state, params):
    """Pure-JAX reference using the same bf16-input / f32-accumulate math."""
    bf = jnp.bfloat16
    h1 = jnp.dot(state.astype(bf), params["w1"].astype(bf),
                 preferred_element_type=jnp.float32) + params["b1"]
    h1 = jnp.maximum(h1, 0.0)
    h2 = jnp.dot(h1.astype(bf), params["w2"].astype(bf),
                 preferred_element_type=jnp.float32) + params["b2"]
    h2 = jnp.maximum(h2, 0.0)
    h3 = jnp.dot(h2.astype(bf), params["w3"].astype(bf),
                 preferred_element_type=jnp.float32) + params["b3"]
    return jnp.tanh(h3)


if __name__ == "__main__":
    key = jax.random.PRNGKey(0)
    k_state, k_params = jax.random.split(key)

    batch = 2
    state_size = 8
    action_size = 4

    state = jax.random.normal(k_state, (batch, state_size), jnp.float32)
    params = init_actor_params(k_params, state_size, action_size)
    prepped = prepare_actor_params(params)   # one-time pad/cast (canonical format)

    out = actor_forward(state, prepped)
    out = jax.block_until_ready(out)

    ref = _reference_forward(state, params)
    assert out.shape == (batch, action_size)
    assert jnp.allclose(out, ref, atol=1e-4, rtol=1e-4), (
        f"max abs err {jnp.max(jnp.abs(out - ref))}")

    print("KERNEL_OK")
</pallas_src>

<mosaic_0001>
module attributes {stable_mosaic.version = 11 : i64} {
  func.func @_actor_kernel(%arg0: i32, %arg1: memref<8x8xf32, #tpu.memory_space<vmem>>, %arg2: memref<8x128xbf16, #tpu.memory_space<vmem>>, %arg3: memref<1x128xf32, #tpu.memory_space<vmem>>, %arg4: memref<128x128xbf16, #tpu.memory_space<vmem>>, %arg5: memref<1x128xf32, #tpu.memory_space<vmem>>, %arg6: memref<128x4xbf16, #tpu.memory_space<vmem>>, %arg7: memref<1x4xf32, #tpu.memory_space<vmem>>, %arg8: memref<8x4xf32, #tpu.memory_space<vmem>>) attributes {dimension_semantics = [#tpu.dimension_semantics<parallel>], iteration_bounds = array<i64: 1>, scalar_prefetch = 0 : i64, scratch_operands = 0 : i64, tpu.core_type = #tpu.core_type<tc>, window_params = [{transform_indices = @transform_0, window_bounds = array<i64: 8, 8>}, {pipeline_mode = #tpu.pipeline_mode<synchronous>, transform_indices = @transform_1, window_bounds = array<i64: 8, 128>}, {pipeline_mode = #tpu.pipeline_mode<synchronous>, transform_indices = @transform_2, window_bounds = array<i64: 1, 128>}, {pipeline_mode = #tpu.pipeline_mode<synchronous>, transform_indices = @transform_3, window_bounds = array<i64: 128, 128>}, {pipeline_mode = #tpu.pipeline_mode<synchronous>, transform_indices = @transform_4, window_bounds = array<i64: 1, 128>}, {pipeline_mode = #tpu.pipeline_mode<synchronous>, transform_indices = @transform_5, window_bounds = array<i64: 128, 4>}, {pipeline_mode = #tpu.pipeline_mode<synchronous>, transform_indices = @transform_6, window_bounds = array<i64: 1, 4>}, {transform_indices = @transform_7, window_bounds = array<i64: 8, 4>}]} {
    %c0 = arith.constant 0 : index
    %c0_0 = arith.constant 0 : index
    %0 = vector.load %arg1[%c0, %c0_0] : memref<8x8xf32, #tpu.memory_space<vmem>>, vector<8x8xf32>
    %1 = arith.truncf %0 : vector<8x8xf32> to vector<8x8xbf16>
    %c0_1 = arith.constant 0 : index
    %c0_2 = arith.constant 0 : index
    %2 = vector.load %arg2[%c0_1, %c0_2] : memref<8x128xbf16, #tpu.memory_space<vmem>>, vector<8x128xbf16>
    %cst = arith.constant dense<0.000000e+00> : vector<8x128xf32>
    %3 = tpu.matmul %1, %2, %cst {dimension_numbers = #tpu.dot_dimension_numbers<[1], [0], [0], [1], [0, 0, 1, 1], [], []>} : vector<8x8xbf16>, vector<8x128xbf16>, vector<8x128xf32> -> vector<8x128xf32>
    %c0_3 = arith.constant 0 : index
    %c0_4 = arith.constant 0 : index
    %4 = vector.load %arg3[%c0_3, %c0_4] : memref<1x128xf32, #tpu.memory_space<vmem>>, vector<1x128xf32>
    %5 = vector.broadcast %4 : vector<1x128xf32> to vector<8x128xf32>
    %6 = arith.addf %3, %5 : vector<8x128xf32>
    %cst_5 = arith.constant 0.000000e+00 : f32
    %7 = vector.broadcast %cst_5 : f32 to vector<8x128xf32>
    %8 = arith.maximumf %6, %7 : vector<8x128xf32>
    %9 = arith.truncf %8 : vector<8x128xf32> to vector<8x128xbf16>
    %c0_6 = arith.constant 0 : index
    %c0_7 = arith.constant 0 : index
    %10 = vector.load %arg4[%c0_6, %c0_7] : memref<128x128xbf16, #tpu.memory_space<vmem>>, vector<128x128xbf16>
    %cst_8 = arith.constant dense<0.000000e+00> : vector<8x128xf32>
    %11 = tpu.matmul %9, %10, %cst_8 {dimension_numbers = #tpu.dot_dimension_numbers<[1], [0], [0], [1], [0, 0, 1, 1], [], []>} : vector<8x128xbf16>, vector<128x128xbf16>, vector<8x128xf32> -> vector<8x128xf32>
    %c0_9 = arith.constant 0 : index
    %c0_10 = arith.constant 0 : index
    %12 = vector.load %arg5[%c0_9, %c0_10] : memref<1x128xf32, #tpu.memory_space<vmem>>, vector<1x128xf32>
    %13 = vector.broadcast %12 : vector<1x128xf32> to vector<8x128xf32>
    %14 = arith.addf %11, %13 : vector<8x128xf32>
    %cst_11 = arith.constant 0.000000e+00 : f32
    %15 = vector.broadcast %cst_11 : f32 to vector<8x128xf32>
    %16 = arith.maximumf %14, %15 : vector<8x128xf32>
    %17 = arith.truncf %16 : vector<8x128xf32> to vector<8x128xbf16>
    %c0_12 = arith.constant 0 : index
    %c0_13 = arith.constant 0 : index
    %18 = vector.load %arg6[%c0_12, %c0_13] : memref<128x4xbf16, #tpu.memory_space<vmem>>, vector<128x4xbf16>
    %cst_14 = arith.constant dense<0.000000e+00> : vector<8x4xf32>
    %19 = tpu.matmul %17, %18, %cst_14 {dimension_numbers = #tpu.dot_dimension_numbers<[1], [0], [0], [1], [0, 0, 1, 1], [], []>} : vector<8x128xbf16>, vector<128x4xbf16>, vector<8x4xf32> -> vector<8x4xf32>
    %c0_15 = arith.constant 0 : index
    %c0_16 = arith.constant 0 : index
    %20 = vector.load %arg7[%c0_15, %c0_16] : memref<1x4xf32, #tpu.memory_space<vmem>>, vector<1x4xf32>
    %21 = vector.broadcast %20 : vector<1x4xf32> to vector<8x4xf32>
    %22 = arith.addf %19, %21 : vector<8x4xf32>
    %23 = math.tanh %22 : vector<8x4xf32>
    %c0_17 = arith.constant 0 : index
    %c0_18 = arith.constant 0 : index
    %24 = vector.load %arg8[%c0_17, %c0_18] : memref<8x4xf32, #tpu.memory_space<vmem>>, vector<8x4xf32>
    tpu.vector_store %arg8[%c0_17, %c0_18], %23 {strides = array<i32>} : memref<8x4xf32, #tpu.memory_space<vmem>>, vector<8x4xf32>,
    return
  }
  func.func @transform_0(%arg0: i32) -> (i32, i32) {
    %c0_i32 = arith.constant 0 : i32
    %c0_i32_0 = arith.constant 0 : i32
    return %arg0, %c0_i32 : i32, i32
  }
  func.func @transform_1(%arg0: i32) -> (i32, i32) {
    %c0_i32 = arith.constant 0 : i32
    %c0_i32_0 = arith.constant 0 : i32
    %c0_i32_1 = arith.constant 0 : i32
    return %c0_i32, %c0_i32_0 : i32, i32
  }
  func.func @transform_2(%arg0: i32) -> (i32, i32) {
    %c0_i32 = arith.constant 0 : i32
    %c0_i32_0 = arith.constant 0 : i32
    %c0_i32_1 = arith.constant 0 : i32
    return %c0_i32, %c0_i32_0 : i32, i32
  }
  func.func @transform_3(%arg0: i32) -> (i32, i32) {
    %c0_i32 = arith.constant 0 : i32
    %c0_i32_0 = arith.constant 0 : i32
    %c0_i32_1 = arith.constant 0 : i32
    return %c0_i32, %c0_i32_0 : i32, i32
  }
  func.func @transform_4(%arg0: i32) -> (i32, i32) {
    %c0_i32 = arith.constant 0 : i32
    %c0_i32_0 = arith.constant 0 : i32
    %c0_i32_1 = arith.constant 0 : i32
    return %c0_i32, %c0_i32_0 : i32, i32
  }
  func.func @transform_5(%arg0: i32) -> (i32, i32) {
    %c0_i32 = arith.constant 0 : i32
    %c0_i32_0 = arith.constant 0 : i32
    %c0_i32_1 = arith.constant 0 : i32
    return %c0_i32, %c0_i32_0 : i32, i32
  }
  func.func @transform_6(%arg0: i32) -> (i32, i32) {
    %c0_i32 = arith.constant 0 : i32
    %c0_i32_0 = arith.constant 0 : i32
    %c0_i32_1 = arith.constant 0 : i32
    return %c0_i32, %c0_i32_0 : i32, i32
  }
  func.func @transform_7(%arg0: i32) -> (i32, i32) {
    %c0_i32 = arith.constant 0 : i32
    %c0_i32_0 = arith.constant 0 : i32
    return %arg0, %c0_i32 : i32, i32
  }
}

</mosaic_0001>

<bundles_post_ra>
// kernel: tpu_custom_call.1
= control target key start
LH: loop header
LB: loop body
LE: loop exit
PB: predicated region body
PF: predicated region fallthrough
CT: control target
= control target key end

     0   :  { %12 = vsyncpa [#allocation3], 0  ;;  %s460_s24 = smov [#allocation2]   ;;  %s592_s0 = inlined_call_operand.hbm [shape: f32[8,8], index: 0, kind: input, shape index: {}]   ;;  %s593_s1 = inlined_call_operand.vmem [shape: bf16[8,128], index: 1, kind: input, shape index: {}]   ;;  %s594_s2 = inlined_call_operand.vmem [shape: f32[1,128], index: 2, kind: input, shape index: {}]   ;;  %s595_s3 = inlined_call_operand.vmem [shape: bf16[128,128], index: 3, kind: input, shape index: {}]   ;;  %s596_s4 = inlined_call_operand.vmem [shape: f32[1,128], index: 4, kind: input, shape index: {}]   ;;  %s597_s5 = inlined_call_operand.vmem [shape: bf16[128,4], index: 5, kind: input, shape index: {}]   ;;  %s598_s6 = inlined_call_operand.vmem [shape: f32[1,4], index: 6, kind: input, shape index: {}]   ;;  %s599_s7 = inlined_call_operand.vmem [shape: f32[8,4], index: 7, kind: output, shape index: {}]  }
   0x1   :  { %s19_s25 = sshll.u32 %s460_s24, 4  ;;  %s20_s25 = int_to_ptr.vmem [resolvable:$true] %s19_s25 }
   0x2   :  { %s446_s26 = scalar_lea.vmem %s20_s25, 128  ;;  %p451_p1 = scmp.lt.s32.totalorder %s20_s25, %s20_s25 }
   0x3   :  { %p447_p0 = scmp.ne.s32.totalorder %s20_s25, %s446_s26  ;;  %p452_p2 = scmp.lt.s32.totalorder %s446_s26, %s446_s26 }
   0x5   :  { %p453_p3 = por %p452_p2, %p451_p1 }
   0x7   :  { %p454_p4 = pnand %p453_p3, %p447_p0 }
   0x9   :  { %457 = shalt.err (!%p454_p4)
}
   0xa   :  { %22 = dma.hbm_to_vmem [thread:$0]  %s592_s0, 128, %s20_s25, [#allocation3]  }
   0xb   :  { %458 = dma.done.wait [#allocation3], 128  }
   0xc   :  { %459 = vsyncadd [#allocation3], 4294967168  ;;  %v461_v0 = vmov 0.0   ;;  %vm462_vm0 = vmmov 0   ;;  %vm53_vm1 = vcmask 1043456   ;;  %v39_v2 = vld [vmem:[#allocation2] sm:$0xff] }
   0xd   :  { %371 = vmatprep.subr.bf16.mxu0 %v461_v0  ;;  %373 = vmatprep.mubr.msk.bf16.mxu0 %vm462_vm0, %v461_v0  ;;  %v41_v1 = vld [vmem:[%s593_s1] sm:$0xf]  ;;  %v40_v4 = vpack.c.bf16 %v39_v2, %v39_v2  ;;  %v420_v5 = vld [vmem:[%s595_s3 + $0x38] sm:$0xff]   ;;  %vm49_vm2 = vcmask 64512   ;;  %v421_v6 = vld [vmem:[%s595_s3 + $0x30] sm:$0xff]   ;;  %vm324_vm3 = vcmask 31744  }
   0xe   :  { %377 = vmatprep.subr.bf16.mxu1 %v461_v0  ;;  %393 = vmatprep.mubr.msk.bf16.mxu1 %vm462_vm0, %v461_v0  ;;  %v55_v3 = vsel %vm53_vm1, %v41_v1, 0  ;;  %v422_v7 = vld [vmem:[%s595_s3 + $0x28] sm:$0xff]   ;;  %v423_v8 = vld [vmem:[%s595_s3 + $0x20] sm:$0xff]   ;;  %v424_v9 = vld [vmem:[%s595_s3 + $0x18] sm:$0xff]  }
   0xf   :  { %372 = vmatpush3.bf16.msra.mxu0 %v55_v3  ;;  %378 = vmatpush3.bf16.msra.mxu1 %v420_v5  ;;  %v425_v10 = vld [vmem:[%s595_s3 + $0x10] sm:$0xff]   ;;  %v426_v11 = vld [vmem:[%s595_s3 + $0x8] sm:$0xff]   ;;  %v427_v12 = vld [vmem:[%s595_s3] sm:$0xff]  }
  0x10   :  { %397 = vmatprep.subr.bf16.mxu0 %v461_v0  ;;  %379 = vmatprep.subr.bf16.mxu1 %v461_v0  ;;  %v428_v13 = vld [vmem:[%s597_s5 + $0x38] sm:$0xff]   ;;  %v429_v14 = vld [vmem:[%s597_s5 + $0x30] sm:$0xff]   ;;  %v430_v15 = vld [vmem:[%s597_s5 + $0x28] sm:$0xff]  }
  0x11   :  { %v431_v16 = vld [vmem:[%s597_s5 + $0x20] sm:$0xff]   ;;  %v432_v17 = vld [vmem:[%s597_s5 + $0x18] sm:$0xff]   ;;  %v433_v18 = vld [vmem:[%s597_s5 + $0x10] sm:$0xff]  }
  0x12   :  { %374 = vmatmul.mubr.msk.bf16.vlgmr.msra.gmra.mxu0 %vm49_vm2, %v40_v4  ;;  %v331_v19 = vld [vmem:[%s594_s2] ss:$0 sm:$0xff]  ;;  %v434_v27 = vld [vmem:[%s597_s5 + $0x8] sm:$0xff]  }
  0x13   :  { %413 = vmatprep.mubr.msk.bf16.mxu0 %vm462_vm0, %v461_v0  ;;  %380 = vmatpush3.bf16.msra.mxu1 %v421_v6  ;;  %v435_v28 = vld [vmem:[%s597_s5] sm:$0xff]  }
  0x14   :  { %381 = vmatprep.subr.bf16.mxu1 %v461_v0  ;;  %398 = vmatpush3.bf16.msra.mxu0 %v428_v13  ;;  %v333_v29 = vld [vmem:[%s596_s4] ss:$0 sm:$0xff] }
  0x15   :  { %399 = vmatprep.subr.bf16.mxu0 %v461_v0  ;;  %v342_v37 = vld [vmem:[%s598_s6] ss:$0 sm:$0xff] }
  0x17   :  { %382 = vmatpush3.bf16.msra.mxu1 %v422_v7 }
  0x18   :  { %383 = vmatprep.subr.bf16.mxu1 %v461_v0  ;;  %400 = vmatpush3.bf16.msra.mxu0 %v429_v14 }
  0x19   :  { %401 = vmatprep.subr.bf16.mxu0 %v461_v0 }
  0x1b   :  { %384 = vmatpush3.bf16.msra.mxu1 %v423_v8 }
  0x1c   :  { %385 = vmatprep.subr.bf16.mxu1 %v461_v0  ;;  %402 = vmatpush3.bf16.msra.mxu0 %v430_v15 }
  0x1d   :  { %403 = vmatprep.subr.bf16.mxu0 %v461_v0 }
  0x1f   :  { %386 = vmatpush3.bf16.msra.mxu1 %v424_v9 }
  0x20   :  { %387 = vmatprep.subr.bf16.mxu1 %v461_v0  ;;  %404 = vmatpush3.bf16.msra.mxu0 %v431_v16 }
  0x21   :  { %405 = vmatprep.subr.bf16.mxu0 %v461_v0 }
  0x23   :  { %388 = vmatpush3.bf16.msra.mxu1 %v425_v10 }
  0x24   :  { %389 = vmatprep.subr.bf16.mxu1 %v461_v0  ;;  %406 = vmatpush3.bf16.msra.mxu0 %v432_v17 }
  0x25   :  { %407 = vmatprep.subr.bf16.mxu0 %v461_v0 }
  0x27   :  { %390 = vmatpush3.bf16.msra.mxu1 %v426_v11 }
  0x28   :  { %391 = vmatprep.subr.bf16.mxu1 %v461_v0  ;;  %408 = vmatpush3.bf16.msra.mxu0 %v433_v18 }
  0x29   :  { %409 = vmatprep.subr.bf16.mxu0 %v461_v0 }
  0x2b   :  { %392 = vmatpush3.bf16.msra.mxu1 %v427_v12 }
  0x2c   :  { %410 = vmatpush3.bf16.msra.mxu0 %v434_v27 }
  0x2d   :  { %411 = vmatprep.subr.bf16.mxu0 %v461_v0 }
  0x30   :  { %412 = vmatpush3.bf16.msra.mxu0 %v435_v28 }
  0xd2   :  { %v91_v20 = vpop.f32.mrf.mxu0 }
  0xd3   :  { %v92_v21 = vadd.f32 %v331_v19, %v91_v20 }
  0xd4   :  { %v375_v22 = vpop.f32.mrf.mxu0 }
  0xd5   :  { %v97_v23 = vmax.f32 %v92_v21, 0.0 }
  0xd6   :  { %v94_v24 = vpop.f32.mrf.mxu0 }
  0xd7   :  { %v98_v25 = vpack.c.bf16 %v97_v23, %v97_v23 }
  0xd8   :  { %v376_v26 = vpop.f32.mrf.mxu0 }
  0xd9   :  { %394 = vmatmul.mubr.bf16.vlgmr.msra.gmra.mxu1 %v98_v25 }
 0x199   :  { %v204_v30 = vpop.f32.mrf.mxu1 }
 0x19a   :  { %v205_v31 = vadd.f32 %v333_v29, %v204_v30 }
 0x19b   :  { %v395_v32 = vpop.f32.mrf.mxu1 }
 0x19c   :  { %v210_v33 = vmax.f32 %v205_v31, 0.0 }
 0x19d   :  { %v207_v34 = vpop.f32.mrf.mxu1 }
 0x19e   :  { %v211_v35 = vpack.c.bf16 %v210_v33, %v210_v33 }
 0x19f   :  { %v396_v36 = vpop.f32.mrf.mxu1 }
 0x1a0   :  { %414 = vmatmul.mubr.bf16.vlgmr.msra.gmra.mxu0 %v211_v35 }
 0x260   :  { %v317_v38 = vpop.f32.mrf.mxu0 }
 0x261   :  { %v318_v39 = vadd.f32 %v342_v37, %v317_v38 }
 0x262   :  { %v415_v40 = vpop.f32.mrf.mxu0 }
 0x263   :  { %436 = vtanh.f32 %v318_v39 }
 0x264   :  { %v320_v41 = vpop.f32.mrf.mxu0 }
 0x266   :  { %v416_v42 = vpop.f32.mrf.mxu0 }
 0x270   :  { %v437_v43 = vpop.eup %436 }
 0x271   :  { %325 = vst.msk [vmem:[%s599_s7] sm:$0xff] %vm324_vm3, %v437_v43 }
 0x272   :  { %330 = vsyncpa [#allocation3], 1 }

</bundles_post_ra>
